<compile_context>
chip_gen: v7x
topology: tpu7x:2x2x1
jax: 0.10.0
libtpu: 0.0.40
codegen_flags: <defaults>
</compile_context>

<pallas_src>
import math

import jax
import jax.numpy as jnp
import numpy as np
from jax.experimental import pallas as pl
from jax.experimental.pallas import tpu as pltpu

# Matmul operand dtype.  jnp.float32 keeps everything inside the strict validation
# tolerance on all chips; on v6e/v7x switch to jnp.bfloat16 (accumulation stays f32 via
# preferred_element_type) for full MXU throughput.
MATMUL_DTYPE = jnp.float32

_BUFFERED_ONE_OK = None
_VMEM_LIMIT = None


# --------------------------------- helpers ----------------------------------

def _mm(a, b):
    """MXU matmul with f32 accumulation; operands optionally down-cast (bf16 on v6e/v7x)."""
    return jnp.dot(a.astype(MATMUL_DTYPE), b.astype(MATMUL_DTYPE),
                   preferred_element_type=jnp.float32)


def _vmem_limit_bytes():
    """Explicit scoped-VMEM budget (defaults are only 16/32 MiB; leave headroom on v7x)."""
    global _VMEM_LIMIT
    if _VMEM_LIMIT is None:
        limit = 48 * 2 ** 20
        try:
            cap = getattr(pltpu.get_tpu_info(), "vmem_capacity_bytes", None)
            if cap:
                limit = int(min(100 * 2 ** 20, 0.8 * cap))
        except Exception:
            pass
        _VMEM_LIMIT = limit
    return _VMEM_LIMIT


def _buffered_one_ok():
    """Probe whether pipeline_mode=pl.Buffered(1) is supported by this jax/Mosaic build."""
    global _BUFFERED_ONE_OK
    if _BUFFERED_ONE_OK is None:
        try:
            def _copy(x_ref, o_ref):
                o_ref[...] = x_ref[...]

            x = jnp.arange(8 * 128, dtype=jnp.float32).reshape(8, 128)
            out = pl.pallas_call(
                _copy,
                out_shape=jax.ShapeDtypeStruct((16, 128), jnp.float32),
                grid=(2,),
                in_specs=[pl.BlockSpec((8, 128), lambda i: (0, 0),
                                       pipeline_mode=pl.Buffered(1))],
                out_specs=pl.BlockSpec((8, 128), lambda i: (i, 0)),
            )(x)
            out = np.asarray(jax.block_until_ready(out))
            xh = np.asarray(x)
            _BUFFERED_ONE_OK = bool(np.array_equal(out, np.concatenate([xh, xh], axis=0)))
        except Exception:
            _BUFFERED_ONE_OK = False
    return _BUFFERED_ONE_OK


def _const_spec(block_shape, index_map):
    """BlockSpec for blocks whose index never changes (weights / biases / projections):
    single-buffer them when supported — double-buffering a constant block only wastes
    VMEM (matters on v7x's 64 MiB); otherwise fall back to the default."""
    if _buffered_one_ok():
        return pl.BlockSpec(block_shape, index_map, pipeline_mode=pl.Buffered(1))
    return pl.BlockSpec(block_shape, index_map)


def _pick_row_tile(rows, target=512):
    """Largest row tile <= target that divides `rows` and respects the (8,128) rule.
    (512-row tiles reach ~85% of HBM roofline for mem-bound steps vs ~63% at 256.)"""
    if rows <= target:
        return rows
    tm = (target // 8) * 8
    while tm >= 8:
        if rows % tm == 0:
            return tm
        tm -= 8
    return rows   # rows not a multiple of 8: single full-dim block is the only safe choice


def _pick_lane_tile(size, target=512):
    """Largest multiple of 128 <= target dividing `size` (lane-dense tiles); else full."""
    if size <= target or size % 128 != 0:
        return size
    t = (target // 128) * 128
    while t >= 128:
        if size % t == 0:
            return t
        t -= 128
    return size


def _erf_f32(x):
    # Abramowitz & Stegun 7.1.26 rational approximation (max abs err ~1.5e-7) built only
    # from ops guaranteed to lower in Mosaic (exp / mul / add / where / abs).
    p = 0.3275911
    a1, a2, a3, a4, a5 = (0.254829592, -0.284496736, 1.421413741,
                          -1.453152027, 1.061405429)
    sign = jnp.where(x < 0.0, -1.0, 1.0)
    z = jnp.abs(x)
    t = 1.0 / (1.0 + p * z)
    poly = ((((a5 * t + a4) * t + a3) * t + a2) * t + a1) * t
    return sign * (1.0 - poly * jnp.exp(-z * z))


def _gelu_exact(x):
    # matches torch nn.GELU() default (erf-based), to ~1e-6
    return 0.5 * x * (1.0 + _erf_f32(x * (1.0 / math.sqrt(2.0))))


# ------------------------------ Pallas kernels -------------------------------

def _ln_qkv_headmajor_kernel(x_ref, g_ref, b_ref, w_ref, bias_ref, o_ref):
    """LayerNorm(x) @ Wqkv + bias, scattered into a head-major (3, heads, tn, d) block."""
    x = x_ref[...].astype(jnp.float32)
    mean = jnp.mean(x, axis=-1, keepdims=True)
    var = jnp.mean((x - mean) ** 2, axis=-1, keepdims=True)
    xn = (x - mean) * jax.lax.rsqrt(var + 1e-5) * g_ref[...] + b_ref[...]
    y = _mm(xn, w_ref[...]) + bias_ref[...]          # (tn, 3*inner), lane-dense matmul

    _, heads, _, d = o_ref.shape
    inner = heads * d
    # Scatter the matmul result into the head-major output layout once, here, so the
    # attention kernel never pays per-head lane-offset relayouts or masked narrow stores.
    for t in range(3):                               # q / k / v
        for h in range(heads):
            off = t * inner + h * d
            o_ref[t, h] = y[:, off:off + d].astype(o_ref.dtype)


def ln_qkv_headmajor_pallas(x, g, b, w, bias, heads, *, tile_n=512):
    bsz, n, dim = x.shape
    three_inner = w.shape[1]
    inner = three_inner // 3
    d = inner // heads
    tn = _pick_row_tile(n, tile_n)
    return pl.pallas_call(
        _ln_qkv_headmajor_kernel,
        out_shape=jax.ShapeDtypeStruct((bsz, 3, heads, n, d), x.dtype),
        grid=(bsz, n // tn),
        in_specs=[
            pl.BlockSpec((None, tn, dim), lambda bi, ti: (bi, ti, 0)),
            _const_spec((1, dim), lambda bi, ti: (0, 0)),
            _const_spec((1, dim), lambda bi, ti: (0, 0)),
            _const_spec((dim, three_inner), lambda bi, ti: (0, 0)),   # weight VMEM resident
            _const_spec((1, three_inner), lambda bi, ti: (0, 0)),
        ],
        out_specs=pl.BlockSpec((None, 3, heads, tn, d),
                               lambda bi, ti: (bi, 0, 0, ti, 0)),
        compiler_params=pltpu.CompilerParams(
            dimension_semantics=("parallel", "parallel"),
            vmem_limit_bytes=_vmem_limit_bytes()),
    )(x, g.reshape(1, dim), b.reshape(1, dim), w, bias.reshape(1, three_inner))


def _attn_out_res_kernel(projt_ref, wo_ref, bo_ref, x_ref, q_ref, k_ref, v_ref,
                         o_ref, acc_ref, *, kernel_eps=1e-4):
    """FAVOR+ non-causal attention for one (batch, head), fused with that head's slice of
    the output projection (accumulated into a lane-dense (n, dim) f32 accumulator) and the
    residual add on the last head.  projt is proj.T pre-scaled by d**-0.25."""
    h = pl.program_id(1)

    @pl.when(h == 0)
    def _():
        acc_ref[...] = jnp.zeros_like(acc_ref)

    d = q_ref.shape[-1]
    m = projt_ref.shape[-1]
    ratio = float(m) ** -0.5
    half_dn_sq = 0.5 * float(d) ** -0.5              # 0.5 * (d ** -0.25) ** 2

    projt = projt_ref[...].astype(jnp.float32)       # (d, m)
    q = q_ref[...].astype(jnp.float32)               # (n, d)  head-major block, no slicing
    k = k_ref[...].astype(jnp.float32)
    v = v_ref[...].astype(jnp.float32)

    # softmax-kernel feature maps (data_normalizer already folded into projt)
    # TODO(synk): on v6e/v7x a block-diagonal (inner, heads*m) projection could batch the
    # 2*heads K=d feature-map matmuls into one K=inner MXU pass; needs per-head segmented
    # reductions for k_max/k_sum/denom.
    q_dash = _mm(q, projt)                           # (n, m)
    k_dash = _mm(k, projt)
    q_diag = jnp.sum(q * q, axis=-1, keepdims=True) * half_dn_sq
    k_diag = jnp.sum(k * k, axis=-1, keepdims=True) * half_dn_sq
    q_max = jnp.max(q_dash, axis=-1, keepdims=True)                       # per row
    k_max = jnp.max(jnp.max(k_dash, axis=-1, keepdims=True),
                    axis=0, keepdims=True)                                # per (b, h)
    # (on v6e/v7x the exp inputs can be bf16 for 2x EUP throughput; kept f32 for tolerance)
    q_prime = ratio * (jnp.exp(q_dash - q_diag - q_max) + kernel_eps)
    k_prime = ratio * (jnp.exp(k_dash - k_diag - k_max) + kernel_eps)

    # non-causal linear attention; normalizer folded into q' before the matmul
    k_sum = jnp.sum(k_prime, axis=0, keepdims=True)                       # (1, m)
    denom = jnp.sum(q_prime * k_sum, axis=-1, keepdims=True)              # (n, 1)
    # approx=True would move this to the EUP slot; kept exact for the 2e-3 validation
    q_norm = q_prime * pl.reciprocal(denom, approx=False)
    context = jax.lax.dot_general(
        k_prime.astype(MATMUL_DTYPE), v.astype(MATMUL_DTYPE),
        (((0,), (0,)), ((), ())), preferred_element_type=jnp.float32)     # (m, d)
    attn = _mm(q_norm, context)                                           # (n, d)

    # per-head partial output projection accumulated into the lane-dense accumulator
    acc_ref[...] += _mm(attn, wo_ref[...])                                # (n, dim)

    @pl.when(h == pl.num_programs(1) - 1)
    def _():
        o_ref[...] = (x_ref[...].astype(jnp.float32) + acc_ref[...] + bo_ref[...]
                      ).astype(o_ref.dtype)


def performer_attention_block_pallas(x, qkvh, proj_t, wo_heads, bo):
    # TODO(synk): for long sequences add a kv-tile pass (online-rescaled k_max / k_sum /
    # context accumulated in VMEM scratch) plus a q-tile grid axis so per-step VMEM stays
    # O(tile_n * max(m, d)) instead of O(n * max(m, dim)).
    bsz, n, dim = x.shape
    _, _, heads, _, d = qkvh.shape
    m = proj_t.shape[1]
    return pl.pallas_call(
        _attn_out_res_kernel,
        out_shape=jax.ShapeDtypeStruct((bsz, n, dim), x.dtype),
        grid=(bsz, heads),
        in_specs=[
            _const_spec((d, m), lambda bi, h: (0, 0)),
            pl.BlockSpec((None, d, dim), lambda bi, h: (h, 0, 0)),        # wo head slice
            _const_spec((1, dim), lambda bi, h: (0, 0)),
            pl.BlockSpec((None, n, dim), lambda bi, h: (bi, 0, 0)),       # residual input
            pl.BlockSpec((None, None, None, n, d), lambda bi, h: (bi, 0, h, 0, 0)),  # q
            pl.BlockSpec((None, None, None, n, d), lambda bi, h: (bi, 1, h, 0, 0)),  # k
            pl.BlockSpec((None, None, None, n, d), lambda bi, h: (bi, 2, h, 0, 0)),  # v
        ],
        out_specs=pl.BlockSpec((None, n, dim), lambda bi, h: (bi, 0, 0)),
        scratch_shapes=[pltpu.VMEM((n, dim), jnp.float32)],
        compiler_params=pltpu.CompilerParams(
            dimension_semantics=("parallel", "arbitrary"),
            vmem_limit_bytes=_vmem_limit_bytes()),
    )(proj_t, wo_heads, bo.reshape(1, dim), x, qkvh, qkvh, qkvh)


def _ln_ffn_res_kernel(x_ref, g_ref, b_ref, w1_ref, b1_ref, w2_ref, b2_ref,
                       o_ref, xn_sc, acc_sc):
    """x + W2( GELU( W1( LayerNorm(x) ) ) ) with the hidden dim streamed in tiles:
    the (tm, hidden) activation never exists in full and w1/w2 are not fully resident."""
    kk = pl.program_id(1)

    @pl.when(kk == 0)
    def _():
        x = x_ref[...].astype(jnp.float32)
        mean = jnp.mean(x, axis=-1, keepdims=True)
        var = jnp.mean((x - mean) ** 2, axis=-1, keepdims=True)
        xn_sc[...] = (x - mean) * jax.lax.rsqrt(var + 1e-5) * g_ref[...] + b_ref[...]
        acc_sc[...] = jnp.zeros_like(acc_sc)

    hblk = _mm(xn_sc[...], w1_ref[...]) + b1_ref[...]    # (tm, th)  never leaves VMEM
    hblk = _gelu_exact(hblk)
    acc_sc[...] += _mm(hblk, w2_ref[...])                # (tm, dim)

    @pl.when(kk == pl.num_programs(1) - 1)
    def _():
        o_ref[...] = (x_ref[...].astype(jnp.float32) + acc_sc[...] + b2_ref[...]
                      ).astype(o_ref.dtype)


def ln_ffn_residual_pallas(x, g, b, w1, b1, w2, b2, *, tile_rows=512, tile_hidden=512):
    rows, dim = x.shape
    hidden = w1.shape[1]
    tm = _pick_row_tile(rows, tile_rows)
    th = _pick_lane_tile(hidden, tile_hidden)
    return pl.pallas_call(
        _ln_ffn_res_kernel,
        out_shape=jax.ShapeDtypeStruct((rows, dim), x.dtype),
        grid=(rows // tm, hidden // th),
        in_specs=[
            pl.BlockSpec((tm, dim), lambda i, k: (i, 0)),
            _const_spec((1, dim), lambda i, k: (0, 0)),
            _const_spec((1, dim), lambda i, k: (0, 0)),
            pl.BlockSpec((dim, th), lambda i, k: (0, k)),    # streamed w1 tiles
            pl.BlockSpec((1, th), lambda i, k: (0, k)),
            pl.BlockSpec((th, dim), lambda i, k: (k, 0)),    # streamed w2 tiles
            _const_spec((1, dim), lambda i, k: (0, 0)),
        ],
        out_specs=pl.BlockSpec((tm, dim), lambda i, k: (i, 0)),
        scratch_shapes=[pltpu.VMEM((tm, dim), jnp.float32),   # LayerNorm(x) cache
                        pltpu.VMEM((tm, dim), jnp.float32)],  # FFN output accumulator
        compiler_params=pltpu.CompilerParams(
            dimension_semantics=("parallel", "arbitrary"),
            vmem_limit_bytes=_vmem_limit_bytes()),
    )(x, g.reshape(1, dim), b.reshape(1, dim), w1, b1.reshape(1, hidden),
      w2, b2.reshape(1, dim))


# ----------------------------- Pallas forward pass ---------------------------

def performer_forward_pallas(x, fused_params, heads):
    b, n, dim = x.shape
    for lp in fused_params["layers"]:
        # attention sublayer: LN+QKV (head-major) kernel, then FAVOR+ + out-proj + residual
        qkvh = ln_qkv_headmajor_pallas(x, lp["ln1_g"], lp["ln1_b"],
                                       lp["wqkv"], lp["bqkv"], heads)
        x = performer_attention_block_pallas(x, qkvh, lp["proj_t"],
                                             lp["wo_heads"], lp["bo"])
        # feed-forward sublayer: single fused LN+FFN+GELU+residual kernel (hidden streamed)
        x = ln_ffn_residual_pallas(
            x.reshape(b * n, dim), lp["ln2_g"], lp["ln2_b"],
            lp["w1"], lp["b1"], lp["w2"], lp["b2"]).reshape(b, n, dim)
    return x


# ----------------------------- pure-JAX reference ----------------------------

def linear_ref(x, w, b):
    return x @ w + b.reshape(1, -1)


def layernorm_ref(x, g, b):
    mean = jnp.mean(x, axis=-1, keepdims=True)
    var = jnp.mean((x - mean) ** 2, axis=-1, keepdims=True)
    return (x - mean) * jax.lax.rsqrt(var + 1e-5) * g.reshape(1, -1) + b.reshape(1, -1)


def performer_attention_ref(q, k, v, proj, eps=1e-4):
    d = q.shape[-1]
    m = proj.shape[0]
    dn = float(d) ** -0.25
    ratio = float(m) ** -0.5
    q_dash = jnp.einsum("bnd,md->bnm", dn * q, proj)
    k_dash = jnp.einsum("bnd,md->bnm", dn * k, proj)
    q_diag = jnp.sum(q * q, -1, keepdims=True) * 0.5 * dn ** 2
    k_diag = jnp.sum(k * k, -1, keepdims=True) * 0.5 * dn ** 2
    q_prime = ratio * (jnp.exp(q_dash - q_diag - jnp.max(q_dash, -1, keepdims=True)) + eps)
    k_prime = ratio * (jnp.exp(k_dash - k_diag - jnp.max(k_dash, axis=(-2, -1), keepdims=True)) + eps)
    k_sum = k_prime.sum(-2)
    d_inv = 1.0 / jnp.einsum("bnm,bm->bn", q_prime, k_sum)
    context = jnp.einsum("bnm,bnd->bmd", k_prime, v)
    return jnp.einsum("bmd,bnm,bn->bnd", context, q_prime, d_inv)


def performer_forward_ref(x, params, heads, dim_head):
    b, n, dim = x.shape

    def split_heads(t):
        return t.reshape(b, n, heads, dim_head).transpose(0, 2, 1, 3).reshape(b * heads, n, dim_head)

    for lp in params["layers"]:
        xf = x.reshape(b * n, dim)
        xn = layernorm_ref(xf, lp["ln1_g"], lp["ln1_b"])
        q = linear_ref(xn, lp["wq"], lp["bq"])
        k = linear_ref(xn, lp["wk"], lp["bk"])
        v = linear_ref(xn, lp["wv"], lp["bv"])
        qh, kh, vh = map(split_heads, (q, k, v))
        oh = performer_attention_ref(qh, kh, vh, lp["proj"])
        o = oh.reshape(b, heads, n, dim_head).transpose(0, 2, 1, 3).reshape(b * n, heads * dim_head)
        o = linear_ref(o, lp["wo"], lp["bo"])
        x = x + o.reshape(b, n, dim)

        xf = x.reshape(b * n, dim)
        xn = layernorm_ref(xf, lp["ln2_g"], lp["ln2_b"])
        h1 = jax.nn.gelu(linear_ref(xn, lp["w1"], lp["b1"]), approximate=False)
        o = linear_ref(h1, lp["w2"], lp["b2"])
        x = x + o.reshape(b, n, dim)
    return x


# --------------------------- parameter construction --------------------------

def gaussian_orthogonal_random_matrix(key, nb_rows, nb_cols):
    # Deterministic re-implementation of the torch helper (scaling=0).
    nb_full_blocks = nb_rows // nb_cols
    blocks = []
    for _ in range(nb_full_blocks):
        key, sub = jax.random.split(key)
        unstructured = jax.random.normal(sub, (nb_cols, nb_cols), jnp.float32)
        qm, _ = jnp.linalg.qr(unstructured)
        blocks.append(qm.T)
    remaining = nb_rows - nb_full_blocks * nb_cols
    if remaining > 0:
        key, sub = jax.random.split(key)
        unstructured = jax.random.normal(sub, (nb_cols, nb_cols), jnp.float32)
        qm, _ = jnp.linalg.qr(unstructured)
        blocks.append(qm.T[:remaining])
    final = jnp.concatenate(blocks, axis=0)
    key, sub = jax.random.split(key)
    multiplier = jnp.linalg.norm(jax.random.normal(sub, (nb_rows, nb_cols), jnp.float32), axis=1)
    return multiplier[:, None] * final


def init_params(key, dim, depth, heads, dim_head, nb_features, ff_mult):
    inner = heads * dim_head
    hidden = dim * ff_mult

    def dense(k, fan_in, fan_out):
        kw, kb = jax.random.split(k)
        bound = 1.0 / math.sqrt(fan_in)
        w = jax.random.uniform(kw, (fan_in, fan_out), jnp.float32, -bound, bound)
        b = jax.random.uniform(kb, (fan_out,), jnp.float32, -bound, bound)
        return w, b

    layers = []
    for _ in range(depth):
        key, *ks = jax.random.split(key, 9)
        wq, bq = dense(ks[0], dim, inner)
        wk, bk = dense(ks[1], dim, inner)
        wv, bv = dense(ks[2], dim, inner)
        wo, bo = dense(ks[3], inner, dim)
        w1, b1 = dense(ks[4], dim, hidden)
        w2, b2 = dense(ks[5], hidden, dim)
        proj = gaussian_orthogonal_random_matrix(ks[6], nb_features, dim_head)
        layers.append(dict(
            ln1_g=jnp.ones((dim,), jnp.float32), ln1_b=jnp.zeros((dim,), jnp.float32),
            ln2_g=jnp.ones((dim,), jnp.float32), ln2_b=jnp.zeros((dim,), jnp.float32),
            wq=wq, bq=bq, wk=wk, bk=bk, wv=wv, bv=bv, wo=wo, bo=bo,
            w1=w1, b1=b1, w2=w2, b2=b2, proj=proj))
    return dict(layers=layers)


def fuse_params(params, heads, dim_head):
    """One-time parameter transforms for the fused kernels: QKV concat (head-major
    columns), data_normalizer folded into the projection, wo reshaped per head."""
    dn = float(dim_head) ** -0.25
    fused = []
    for lp in params["layers"]:
        f = dict(lp)
        f["wqkv"] = jnp.concatenate([lp["wq"], lp["wk"], lp["wv"]], axis=1)
        f["bqkv"] = jnp.concatenate([lp["bq"], lp["bk"], lp["bv"]], axis=0)
        f["proj_t"] = (dn * lp["proj"]).T                     # (d, m)
        f["wo_heads"] = lp["wo"].reshape(heads, dim_head, lp["wo"].shape[1])
        fused.append(f)
    return dict(layers=fused)


# ----------------------------------- main ------------------------------------

if __name__ == "__main__":
    B, N, DIM = 2, 8, 32
    HEADS, DIM_HEAD = 4, 8
    DEPTH, FF_MULT = 2, 4
    NB_FEATURES = int(DIM_HEAD * math.log(DIM_HEAD))  # default nb_features = 16

    key = jax.random.PRNGKey(0)
    key, pkey, xkey = jax.random.split(key, 3)
    params = init_params(pkey, DIM, DEPTH, HEADS, DIM_HEAD, NB_FEATURES, FF_MULT)
    fused_params = fuse_params(params, HEADS, DIM_HEAD)
    x = jax.random.normal(xkey, (B, N, DIM), jnp.float32)

    out = performer_forward_pallas(x, fused_params, HEADS)
    out = jax.block_until_ready(out)

    ref = performer_forward_ref(x, params, HEADS, DIM_HEAD)
    ref = jax.block_until_ready(ref)
    np.testing.assert_allclose(np.asarray(out), np.asarray(ref), rtol=2e-3, atol=2e-3)

    print("KERNEL_OK")
</pallas_src>

<mosaic_0001>
module attributes {stable_mosaic.version = 11 : i64} {
  func.func @_copy(%arg0: i32, %arg1: memref<8x128xf32, #tpu.memory_space<vmem>>, %arg2: memref<8x128xf32, #tpu.memory_space<vmem>>) attributes {dimension_semantics = [#tpu.dimension_semantics<arbitrary>], iteration_bounds = array<i64: 2>, scalar_prefetch = 0 : i64, scratch_operands = 0 : i64, tpu.core_type = #tpu.core_type<tc>, window_params = [{pipeline_mode = #tpu.pipeline_mode<synchronous>, transform_indices = @transform_0, window_bounds = array<i64: 8, 128>}, {transform_indices = @transform_1, window_bounds = array<i64: 8, 128>}]} {
    %c0 = arith.constant 0 : index
    %c0_0 = arith.constant 0 : index
    %0 = vector.load %arg1[%c0, %c0_0] : memref<8x128xf32, #tpu.memory_space<vmem>>, vector<8x128xf32>
    %c0_1 = arith.constant 0 : index
    %c0_2 = arith.constant 0 : index
    %1 = vector.load %arg2[%c0_1, %c0_2] : memref<8x128xf32, #tpu.memory_space<vmem>>, vector<8x128xf32>
    tpu.vector_store %arg2[%c0_1, %c0_2], %0 {strides = array<i32>} : memref<8x128xf32, #tpu.memory_space<vmem>>, vector<8x128xf32>,
    return
  }
  func.func @transform_0(%arg0: i32) -> (i32, i32) {
    %c0_i32 = arith.constant 0 : i32
    %c0_i32_0 = arith.constant 0 : i32
    %c0_i32_1 = arith.constant 0 : i32
    return %c0_i32, %c0_i32_0 : i32, i32
  }
  func.func @transform_1(%arg0: i32) -> (i32, i32) {
    %c0_i32 = arith.constant 0 : i32
    %c0_i32_0 = arith.constant 0 : i32
    return %arg0, %c0_i32 : i32, i32
  }
}

module attributes {stable_mosaic.version = 11 : i64} {
  func.func @_ln_qkv_headmajor_kernel(%arg0: i32, %arg1: i32, %arg2: memref<1x8x32xf32, #tpu.memory_space<vmem>>, %arg3: memref<1x32xf32, #tpu.memory_space<vmem>>, %arg4: memref<1x32xf32, #tpu.memory_space<vmem>>, %arg5: memref<32x96xf32, #tpu.memory_space<vmem>>, %arg6: memref<1x96xf32, #tpu.memory_space<vmem>>, %arg7: memref<1x3x4x8x8xf32, #tpu.memory_space<vmem>>) attributes {dimension_semantics = [#tpu.dimension_semantics<parallel>, #tpu.dimension_semantics<parallel>], iteration_bounds = array<i64: 2, 1>, scalar_prefetch = 0 : i64, scratch_operands = 0 : i64, tpu.core_type = #tpu.core_type<tc>, window_params = [{transform_indices = @transform_0, window_bounds = array<i64: 1, 8, 32>}, {pipeline_mode = #tpu.pipeline_mode<synchronous>, transform_indices = @transform_1, window_bounds = array<i64: 1, 32>}, {pipeline_mode = #tpu.pipeline_mode<synchronous>, transform_indices = @transform_2, window_bounds = array<i64: 1, 32>}, {pipeline_mode = #tpu.pipeline_mode<synchronous>, transform_indices = @transform_3, window_bounds = array<i64: 32, 96>}, {pipeline_mode = #tpu.pipeline_mode<synchronous>, transform_indices = @transform_4, window_bounds = array<i64: 1, 96>}, {transform_indices = @transform_5, window_bounds = array<i64: 1, 3, 4, 8, 8>}]} {
    %c0 = arith.constant 0 : index
    %c0_0 = arith.constant 0 : index
    %c0_1 = arith.constant 0 : index
    %0 = vector.load %arg2[%c0, %c0_0, %c0_1] : memref<1x8x32xf32, #tpu.memory_space<vmem>>, vector<1x8x32xf32>
    %1 = vector.shape_cast %0 : vector<1x8x32xf32> to vector<8x32xf32>
    %cst = arith.constant dense<0.000000e+00> : vector<8xf32>
    %2 = vector.multi_reduction <add>, %1, %cst [1] : vector<8x32xf32> to vector<8xf32>
    %3 = vector.shape_cast %2 : vector<8xf32> to vector<8x1xf32>
    %cst_2 = arith.constant 3.200000e+01 : f32
    %4 = vector.broadcast %cst_2 : f32 to vector<8x1xf32>
    %5 = arith.divf %3, %4 : vector<8x1xf32>
    %6 = vector.broadcast %5 : vector<8x1xf32> to vector<8x32xf32>
    %7 = arith.subf %1, %6 : vector<8x32xf32>
    %8 = arith.mulf %7, %7 : vector<8x32xf32>
    %cst_3 = arith.constant dense<0.000000e+00> : vector<8xf32>
    %9 = vector.multi_reduction <add>, %8, %cst_3 [1] : vector<8x32xf32> to vector<8xf32>
    %10 = vector.shape_cast %9 : vector<8xf32> to vector<8x1xf32>
    %cst_4 = arith.constant 3.200000e+01 : f32
    %11 = vector.broadcast %cst_4 : f32 to vector<8x1xf32>
    %12 = arith.divf %10, %11 : vector<8x1xf32>
    %13 = vector.broadcast %5 : vector<8x1xf32> to vector<8x32xf32>
    %14 = arith.subf %1, %13 : vector<8x32xf32>
    %cst_5 = arith.constant 9.99999974E-6 : f32
    %15 = vector.broadcast %cst_5 : f32 to vector<8x1xf32>
    %16 = arith.addf %12, %15 : vector<8x1xf32>
    %17 = math.rsqrt %16 : vector<8x1xf32>
    %18 = vector.broadcast %17 : vector<8x1xf32> to vector<8x32xf32>
    %19 = arith.mulf %14, %18 : vector<8x32xf32>
    %c0_6 = arith.constant 0 : index
    %c0_7 = arith.constant 0 : index
    %20 = vector.load %arg3[%c0_6, %c0_7] : memref<1x32xf32, #tpu.memory_space<vmem>>, vector<1x32xf32>
    %21 = vector.broadcast %20 : vector<1x32xf32> to vector<8x32xf32>
    %22 = arith.mulf %19, %21 : vector<8x32xf32>
    %c0_8 = arith.constant 0 : index
    %c0_9 = arith.constant 0 : index
    %23 = vector.load %arg4[%c0_8, %c0_9] : memref<1x32xf32, #tpu.memory_space<vmem>>, vector<1x32xf32>
    %24 = vector.broadcast %23 : vector<1x32xf32> to vector<8x32xf32>
    %25 = arith.addf %22, %24 : vector<8x32xf32>
    %c0_10 = arith.constant 0 : index
    %c0_11 = arith.constant 0 : index
    %26 = vector.load %arg5[%c0_10, %c0_11] : memref<32x96xf32, #tpu.memory_space<vmem>>, vector<32x96xf32>
    %cst_12 = arith.constant dense<0.000000e+00> : vector<8x96xf32>
    %27 = tpu.matmul %25, %26, %cst_12 {dimension_numbers = #tpu.dot_dimension_numbers<[1], [0], [0], [1], [0, 0, 1, 1], [], []>} : vector<8x32xf32>, vector<32x96xf32>, vector<8x96xf32> -> vector<8x96xf32>
    %c0_13 = arith.constant 0 : index
    %c0_14 = arith.constant 0 : index
    %28 = vector.load %arg6[%c0_13, %c0_14] : memref<1x96xf32, #tpu.memory_space<vmem>>, vector<1x96xf32>
    %29 = vector.broadcast %28 : vector<1x96xf32> to vector<8x96xf32>
    %30 = arith.addf %27, %29 : vector<8x96xf32>
    %31 = vector.extract_strided_slice %30 {offsets = [0, 0], sizes = [8, 8], strides = [1, 1]} : vector<8x96xf32> to vector<8x8xf32>
    %c0_15 = arith.constant 0 : index
    %c0_16 = arith.constant 0 : index
    %c0_17 = arith.constant 0 : index
    %c0_18 = arith.constant 0 : index
    %c0_19 = arith.constant 0 : index
    %32 = vector.load %arg7[%c0_15, %c0_16, %c0_17, %c0_18, %c0_19] : memref<1x3x4x8x8xf32, #tpu.memory_space<vmem>>, vector<1x1x1x8x8xf32>
    %33 = vector.shape_cast %32 : vector<1x1x1x8x8xf32> to vector<8x8xf32>
    %34 = vector.shape_cast %31 : vector<8x8xf32> to vector<1x1x1x8x8xf32>
    tpu.vector_store %arg7[%c0_15, %c0_16, %c0_17, %c0_18, %c0_19], %34 {strides = array<i32>} : memref<1x3x4x8x8xf32, #tpu.memory_space<vmem>>, vector<1x1x1x8x8xf32>,
    %35 = vector.extract_strided_slice %30 {offsets = [0, 8], sizes = [8, 8], strides = [1, 1]} : vector<8x96xf32> to vector<8x8xf32>
    %c0_20 = arith.constant 0 : index
    %c0_21 = arith.constant 0 : index
    %c1 = arith.constant 1 : index
    %c0_22 = arith.constant 0 : index
    %c0_23 = arith.constant 0 : index
    %36 = vector.load %arg7[%c0_20, %c0_21, %c1, %c0_22, %c0_23] : memref<1x3x4x8x8xf32, #tpu.memory_space<vmem>>, vector<1x1x1x8x8xf32>
    %37 = vector.shape_cast %36 : vector<1x1x1x8x8xf32> to vector<8x8xf32>
    %38 = vector.shape_cast %35 : vector<8x8xf32> to vector<1x1x1x8x8xf32>
    tpu.vector_store %arg7[%c0_20, %c0_21, %c1, %c0_22, %c0_23], %38 {strides = array<i32>} : memref<1x3x4x8x8xf32, #tpu.memory_space<vmem>>, vector<1x1x1x8x8xf32>,
    %39 = vector.extract_strided_slice %30 {offsets = [0, 16], sizes = [8, 8], strides = [1, 1]} : vector<8x96xf32> to vector<8x8xf32>
    %c0_24 = arith.constant 0 : index
    %c0_25 = arith.constant 0 : index
    %c2 = arith.constant 2 : index
    %c0_26 = arith.constant 0 : index
    %c0_27 = arith.constant 0 : index
    %40 = vector.load %arg7[%c0_24, %c0_25, %c2, %c0_26, %c0_27] : memref<1x3x4x8x8xf32, #tpu.memory_space<vmem>>, vector<1x1x1x8x8xf32>
    %41 = vector.shape_cast %40 : vector<1x1x1x8x8xf32> to vector<8x8xf32>
    %42 = vector.shape_cast %39 : vector<8x8xf32> to vector<1x1x1x8x8xf32>
    tpu.vector_store %arg7[%c0_24, %c0_25, %c2, %c0_26, %c0_27], %42 {strides = array<i32>} : memref<1x3x4x8x8xf32, #tpu.memory_space<vmem>>, vector<1x1x1x8x8xf32>,
    %43 = vector.extract_strided_slice %30 {offsets = [0, 24], sizes = [8, 8], strides = [1, 1]} : vector<8x96xf32> to vector<8x8xf32>
    %c0_28 = arith.constant 0 : index
    %c0_29 = arith.constant 0 : index
    %c3 = arith.constant 3 : index
    %c0_30 = arith.constant 0 : index
    %c0_31 = arith.constant 0 : index
    %44 = vector.load %arg7[%c0_28, %c0_29, %c3, %c0_30, %c0_31] : memref<1x3x4x8x8xf32, #tpu.memory_space<vmem>>, vector<1x1x1x8x8xf32>
    %45 = vector.shape_cast %44 : vector<1x1x1x8x8xf32> to vector<8x8xf32>
    %46 = vector.shape_cast %43 : vector<8x8xf32> to vector<1x1x1x8x8xf32>
    tpu.vector_store %arg7[%c0_28, %c0_29, %c3, %c0_30, %c0_31], %46 {strides = array<i32>} : memref<1x3x4x8x8xf32, #tpu.memory_space<vmem>>, vector<1x1x1x8x8xf32>,
    %47 = vector.extract_strided_slice %30 {offsets = [0, 32], sizes = [8, 8], strides = [1, 1]} : vector<8x96xf32> to vector<8x8xf32>
    %c0_32 = arith.constant 0 : index
    %c1_33 = arith.constant 1 : index
    %c0_34 = arith.constant 0 : index
    %c0_35 = arith.constant 0 : index
    %c0_36 = arith.constant 0 : index
    %48 = vector.load %arg7[%c0_32, %c1_33, %c0_34, %c0_35, %c0_36] : memref<1x3x4x8x8xf32, #tpu.memory_space<vmem>>, vector<1x1x1x8x8xf32>
    %49 = vector.shape_cast %48 : vector<1x1x1x8x8xf32> to vector<8x8xf32>
    %50 = vector.shape_cast %47 : vector<8x8xf32> to vector<1x1x1x8x8xf32>
    tpu.vector_store %arg7[%c0_32, %c1_33, %c0_34, %c0_35, %c0_36], %50 {strides = array<i32>} : memref<1x3x4x8x8xf32, #tpu.memory_space<vmem>>, vector<1x1x1x8x8xf32>,
    %51 = vector.extract_strided_slice %30 {offsets = [0, 40], sizes = [8, 8], strides = [1, 1]} : vector<8x96xf32> to vector<8x8xf32>
    %c0_37 = arith.constant 0 : index
    %c1_38 = arith.constant 1 : index
    %c1_39 = arith.constant 1 : index
    %c0_40 = arith.constant 0 : index
    %c0_41 = arith.constant 0 : index
    %52 = vector.load %arg7[%c0_37, %c1_38, %c1_39, %c0_40, %c0_41] : memref<1x3x4x8x8xf32, #tpu.memory_space<vmem>>, vector<1x1x1x8x8xf32>
    %53 = vector.shape_cast %52 : vector<1x1x1x8x8xf32> to vector<8x8xf32>
    %54 = vector.shape_cast %51 : vector<8x8xf32> to vector<1x1x1x8x8xf32>
    tpu.vector_store %arg7[%c0_37, %c1_38, %c1_39, %c0_40, %c0_41], %54 {strides = array<i32>} : memref<1x3x4x8x8xf32, #tpu.memory_space<vmem>>, vector<1x1x1x8x8xf32>,
    %55 = vector.extract_strided_slice %30 {offsets = [0, 48], sizes = [8, 8], strides = [1, 1]} : vector<8x96xf32> to vector<8x8xf32>
    %c0_42 = arith.constant 0 : index
    %c1_43 = arith.constant 1 : index
    %c2_44 = arith.constant 2 : index
    %c0_45 = arith.constant 0 : index
    %c0_46 = arith.constant 0 : index
    %56 = vector.load %arg7[%c0_42, %c1_43, %c2_44, %c0_45, %c0_46] : memref<1x3x4x8x8xf32, #tpu.memory_space<vmem>>, vector<1x1x1x8x8xf32>
    %57 = vector.shape_cast %56 : vector<1x1x1x8x8xf32> to vector<8x8xf32>
    %58 = vector.shape_cast %55 : vector<8x8xf32> to vector<1x1x1x8x8xf32>
    tpu.vector_store %arg7[%c0_42, %c1_43, %c2_44, %c0_45, %c0_46], %58 {strides = array<i32>} : memref<1x3x4x8x8xf32, #tpu.memory_space<vmem>>, vector<1x1x1x8x8xf32>,
    %59 = vector.extract_strided_slice %30 {offsets = [0, 56], sizes = [8, 8], strides = [1, 1]} : vector<8x96xf32> to vector<8x8xf32>
    %c0_47 = arith.constant 0 : index
    %c1_48 = arith.constant 1 : index
    %c3_49 = arith.constant 3 : index
    %c0_50 = arith.constant 0 : index
    %c0_51 = arith.constant 0 : index
    %60 = vector.load %arg7[%c0_47, %c1_48, %c3_49, %c0_50, %c0_51] : memref<1x3x4x8x8xf32, #tpu.memory_space<vmem>>, vector<1x1x1x8x8xf32>
    %61 = vector.shape_cast %60 : vector<1x1x1x8x8xf32> to vector<8x8xf32>
    %62 = vector.shape_cast %59 : vector<8x8xf32> to vector<1x1x1x8x8xf32>
    tpu.vector_store %arg7[%c0_47, %c1_48, %c3_49, %c0_50, %c0_51], %62 {strides = array<i32>} : memref<1x3x4x8x8xf32, #tpu.memory_space<vmem>>, vector<1x1x1x8x8xf32>,
    %63 = vector.extract_strided_slice %30 {offsets = [0, 64], sizes = [8, 8], strides = [1, 1]} : vector<8x96xf32> to vector<8x8xf32>
    %c0_52 = arith.constant 0 : index
    %c2_53 = arith.constant 2 : index
    %c0_54 = arith.constant 0 : index
    %c0_55 = arith.constant 0 : index
    %c0_56 = arith.constant 0 : index
    %64 = vector.load %arg7[%c0_52, %c2_53, %c0_54, %c0_55, %c0_56] : memref<1x3x4x8x8xf32, #tpu.memory_space<vmem>>, vector<1x1x1x8x8xf32>
    %65 = vector.shape_cast %64 : vector<1x1x1x8x8xf32> to vector<8x8xf32>
    %66 = vector.shape_cast %63 : vector<8x8xf32> to vector<1x1x1x8x8xf32>
    tpu.vector_store %arg7[%c0_52, %c2_53, %c0_54, %c0_55, %c0_56], %66 {strides = array<i32>} : memref<1x3x4x8x8xf32, #tpu.memory_space<vmem>>, vector<1x1x1x8x8xf32>,
    %67 = vector.extract_strided_slice %30 {offsets = [0, 72], sizes = [8, 8], strides = [1, 1]} : vector<8x96xf32> to vector<8x8xf32>
    %c0_57 = arith.constant 0 : index
    %c2_58 = arith.constant 2 : index
    %c1_59 = arith.constant 1 : index
    %c0_60 = arith.constant 0 : index
    %c0_61 = arith.constant 0 : index
    %68 = vector.load %arg7[%c0_57, %c2_58, %c1_59, %c0_60, %c0_61] : memref<1x3x4x8x8xf32, #tpu.memory_space<vmem>>, vector<1x1x1x8x8xf32>
    %69 = vector.shape_cast %68 : vector<1x1x1x8x8xf32> to vector<8x8xf32>
    %70 = vector.shape_cast %67 : vector<8x8xf32> to vector<1x1x1x8x8xf32>
    tpu.vector_store %arg7[%c0_57, %c2_58, %c1_59, %c0_60, %c0_61], %70 {strides = array<i32>} : memref<1x3x4x8x8xf32, #tpu.memory_space<vmem>>, vector<1x1x1x8x8xf32>,
    %71 = vector.extract_strided_slice %30 {offsets = [0, 80], sizes = [8, 8], strides = [1, 1]} : vector<8x96xf32> to vector<8x8xf32>
    %c0_62 = arith.constant 0 : index
    %c2_63 = arith.constant 2 : index
    %c2_64 = arith.constant 2 : index
    %c0_65 = arith.constant 0 : index
    %c0_66 = arith.constant 0 : index
    %72 = vector.load %arg7[%c0_62, %c2_63, %c2_64, %c0_65, %c0_66] : memref<1x3x4x8x8xf32, #tpu.memory_space<vmem>>, vector<1x1x1x8x8xf32>
    %73 = vector.shape_cast %72 : vector<1x1x1x8x8xf32> to vector<8x8xf32>
    %74 = vector.shape_cast %71 : vector<8x8xf32> to vector<1x1x1x8x8xf32>
    tpu.vector_store %arg7[%c0_62, %c2_63, %c2_64, %c0_65, %c0_66], %74 {strides = array<i32>} : memref<1x3x4x8x8xf32, #tpu.memory_space<vmem>>, vector<1x1x1x8x8xf32>,
    %75 = vector.extract_strided_slice %30 {offsets = [0, 88], sizes = [8, 8], strides = [1, 1]} : vector<8x96xf32> to vector<8x8xf32>
    %c0_67 = arith.constant 0 : index
    %c2_68 = arith.constant 2 : index
    %c3_69 = arith.constant 3 : index
    %c0_70 = arith.constant 0 : index
    %c0_71 = arith.constant 0 : index
    %76 = vector.load %arg7[%c0_67, %c2_68, %c3_69, %c0_70, %c0_71] : memref<1x3x4x8x8xf32, #tpu.memory_space<vmem>>, vector<1x1x1x8x8xf32>
    %77 = vector.shape_cast %76 : vector<1x1x1x8x8xf32> to vector<8x8xf32>
    %78 = vector.shape_cast %75 : vector<8x8xf32> to vector<1x1x1x8x8xf32>
    tpu.vector_store %arg7[%c0_67, %c2_68, %c3_69, %c0_70, %c0_71], %78 {strides = array<i32>} : memref<1x3x4x8x8xf32, #tpu.memory_space<vmem>>, vector<1x1x1x8x8xf32>,
    return
  }
  func.func @transform_0(%arg0: i32, %arg1: i32) -> (i32, i32, i32) {
    %c0_i32 = arith.constant 0 : i32
    %c0_i32_0 = arith.constant 0 : i32
    return %arg0, %arg1, %c0_i32 : i32, i32, i32
  }
  func.func @transform_1(%arg0: i32, %arg1: i32) -> (i32, i32) {
    %c0_i32 = arith.constant 0 : i32
    %c0_i32_0 = arith.constant 0 : i32
    %c0_i32_1 = arith.constant 0 : i32
    return %c0_i32, %c0_i32_0 : i32, i32
  }
  func.func @transform_2(%arg0: i32, %arg1: i32) -> (i32, i32) {
    %c0_i32 = arith.constant 0 : i32
    %c0_i32_0 = arith.constant 0 : i32
    %c0_i32_1 = arith.constant 0 : i32
    return %c0_i32, %c0_i32_0 : i32, i32
  }
  func.func @transform_3(%arg0: i32, %arg1: i32) -> (i32, i32) {
    %c0_i32 = arith.constant 0 : i32
    %c0_i32_0 = arith.constant 0 : i32
    %c0_i32_1 = arith.constant 0 : i32
    return %c0_i32, %c0_i32_0 : i32, i32
  }
  func.func @transform_4(%arg0: i32, %arg1: i32) -> (i32, i32) {
    %c0_i32 = arith.constant 0 : i32
    %c0_i32_0 = arith.constant 0 : i32
    %c0_i32_1 = arith.constant 0 : i32
    return %c0_i32, %c0_i32_0 : i32, i32
  }
  func.func @transform_5(%arg0: i32, %arg1: i32) -> (i32, i32, i32, i32, i32) {
    %c0_i32 = arith.constant 0 : i32
    %c0_i32_0 = arith.constant 0 : i32
    %c0_i32_1 = arith.constant 0 : i32
    %c0_i32_2 = arith.constant 0 : i32
    return %arg0, %c0_i32, %c0_i32_0, %arg1, %c0_i32_1 : i32, i32, i32, i32, i32
  }
}

</mosaic_0001>

<bundles_post_ra>
// kernel: tpu_custom_call.1
= control target key start
LH: loop header
LB: loop body
LE: loop exit
PB: predicated region body
PF: predicated region fallthrough
CT: control target
= control target key end

     0   :  { %6 = vsyncpa [#allocation3], 0  ;;  %s481_s0 = inlined_call_operand.hbm [shape: f32[8,128], index: 0, kind: input, shape index: {}]   ;;  %s482_s1 = inlined_call_operand.hbm [shape: f32[16,128], index: 1, kind: output, shape index: {}]  }
   0x1   :  { %7 = vsyncpa [#allocation4], 0 }
   0x2   :  { %9 = vsyncpa [#allocation4 + $0x1], 0  ;;  %s351_s6 = smov 0   ;;  %s353_s7 = smov 0  }
   0x3   :  { %s355_s8 = smov 0   ;;  %s357_s9 = smov 0  }
   0x4 LB: > { %s372_s10 = sadd.s32 4294967295, %s337_s9   ;;  %s183_s11 = sadd.s32 4294967294, %s337_s9   ;;  %s337_s9 = sphi %s357_s9, %s498_s9   ;;  %s333_s8 = sphi %s355_s8, %s497_s8   ;;  %s329_s7 = sphi %s353_s7, %s496_s7   ;;  %s325_s6 = sphi %s351_s6, %s495_s6  }
   0x5   : > { %s376_s12 = sadd.s32 1, %s337_s9   ;;  %s43_s13 = sadd.s32 1, %s333_s8 }
   0x6   : > { %s40_s14 = ssub.s32 %s337_s9, %s376_s12  ;;  %p53_p0 = scmp.ne.s32.totalorder %s333_s8, %s329_s7 }
   0x7   : > { %p41_p1 = scmp.eq.s32.totalorder %s40_s14, 0  ;;  %p54_p2 = scmp.eq.s32.totalorder %s372_s10, 1 }
   0x8   : > { %p59_p3 = scmp.ne.s32.totalorder %s329_s7, %s325_s6  ;;  %p60_p4 = scmp.eq.s32.totalorder %s183_s11, 1 }
   0x9   : > { %s387_s15 = scalar_select %p41_p1, %s333_s8, %s43_s13  }
   0xa   : > { %p389_p5 = por %p54_p2, %p53_p0  ;;  %p393_p6 = por %p60_p4, %p59_p3 }
   0xb   : > { %p184_p7 = scmp.ge.s32.totalorder %s337_s9, 1  ;;  %p67_p8 = scmp.lt.s32.totalorder %s337_s9, 3 }
   0xc   : > { %s486_s16 = scalar_select %p389_p5, 1, 0 }
   0xd   : > { %s487_s17 = scalar_select %p393_p6, 1, 0 }
   0xe   : > { %p483_p9 = scmp.eq.s32.totalorder %s372_s10, 0  ;;  %p400_p10 = pnand %p184_p7, %p67_p8 }
   0xf   : > { %s339_s19 = smov [#allocation2]   ;;  %s243_s24 = scalar_lea.hbm %s481_s0, 128 }
  0x10   : > { %s488_s18 = scalar_select %p400_p10, 1, 0 }
  0x11   : > { %s80_s20 = sshll.u32 %s339_s19, 4  ;;  %p199_p11 = pneg %p400_p10  ;;  %s81_s20 = int_to_ptr.vmem [resolvable:$true] %s80_s20 }
  0x12   : > { %p244_p13 = scmp.ne.s32.totalorder %s481_s0, %s243_s24  ;;  %p250_p3 = scmp.lt.u32.totalorder %s243_s24, %s481_s0 }
  0x13   : > { %p408_p12 = pnand %p483_p9, %p199_p11 }
  0x15   : > { %p245_p0 = pneg %p408_p12 }
  0x17   : > { %p246_p1 = pnand %p245_p0, %p244_p13 }
  0x19   : > { %p247_p2 = pneg %p246_p1 }
  0x1b   : > { %p252_p4 = pnand %p250_p3, %p247_p2 }
  0x1d   : > { %255 = shalt.err (!%p252_p4)
}
  0x1e   : > { %s256_s29 = scalar_lea.vmem %s81_s20, 128  ;;  %p264_p9 = scmp.lt.s32.totalorder %s81_s20, %s81_s20 }
  0x1f   : > { %p257_p7 = scmp.ne.s32.totalorder %s81_s20, %s256_s29  ;;  %p265_p6 = scmp.lt.s32.totalorder %s256_s29, %s256_s29 }
  0x21   : > { %p259_p8 = pnand %p257_p7, %p245_p0  ;;  %p266_p5 = por %p265_p6, %p264_p9 }
  0x23   : > { %p260_p11 = pneg %p259_p8 }
  0x25   : > { %p267_p10 = pnand %p266_p5, %p260_p11 }
  0x27   : > { %270 = shalt.err (!%p267_p10)
}
  0x28   : > { %202 = dma.hbm_to_vmem [thread:$0]  (!%p408_p12), %s481_s0, 128, %s81_s20, [#allocation3]  }
  0x29   : > { %p490_p13 = scmp.ne.s32.totalorder %s488_s18, 0 }
  0x2a   : > { %p491_p1 = scmp.eq.s32.totalorder (!%p490_p13), %s372_s10, 0 }
  0x2b   : > { %93 = sbr.rel (%p490_p13) target bundleno = 77 (0x4d), region = 24 }
  0x32   : > { %316 = dma.done.wait (%p491_p1), [#allocation3], 128   ;;  %p492_p0 = pmov %p491_p1 }
  0x33   : > { %s105_s3 = sand.u32 1, %s329_s7   ;;  %s190_s13 = sshll.u32 %s372_s10, 7  ;;  %v108_v0 = vld [vmem:[#allocation2] sm:$0xff] }
  0x34   : > { %318 = vsyncadd (%p492_p0), [#allocation3], 4294967168  ;;  %s188_s4 = sshll.u32 %s105_s3, 3  ;;  %s441_s18 = scalar_lea.hbm %s482_s1, %s190_s13 }
  0x35   : > { %s107_s5 = scalar_lea.vmem [#allocation5], %s188_s4  ;;  %s111_s20 = scalar_lea.sflag [#allocation4], %s105_s3 }
  0x36   : > { %s124_s11 = sshll.u32 %s107_s5, 4  ;;  %109 = vst [vmem:[%s107_s5] sm:$0xff] %v108_v0  ;;  %p493_p6 = scmp.ne.s32.totalorder %s486_s16, 0  ;;  %s436_s11 = int_to_ptr.vmem [resolvable:$true] %s124_s11 }
  0x37   : > { %s271_s21 = scalar_lea.vmem %s436_s11, 128  ;;  %s340_s22 = smov [#allocation5]  }
  0x38   : > { %p272_p5 = scmp.ne.s32.totalorder %s436_s11, %s271_s21  ;;  %s275_s10 = sshll.u32 %s340_s22, 4  ;;  %s276_s10 = int_to_ptr.vmem [resolvable:$false] %s275_s10 }
  0x39   : > { %s277_s23 = scalar_lea.vmem %s276_s10, 256  ;;  %p278_p12 = scmp.lt.s32.totalorder %s436_s11, %s276_s10 }
  0x3a   : > { %p273_p9 = pnand %p272_p5, %p493_p6  ;;  %p279_p2 = scmp.lt.s32.totalorder %s277_s23, %s271_s21 }
  0x3c   : > { %p274_p10 = pneg %p273_p9  ;;  %p280_p3 = por %p279_p2, %p278_p12 }
  0x3e   : > { %p281_p4 = pnand %p280_p3, %p274_p10 }
  0x40   : > { %284 = shalt.err (!%p281_p4)
}
  0x41   : > { %s285_s24 = scalar_lea.hbm %s441_s18, 128  ;;  %s289_s27 = scalar_lea.hbm %s482_s1, 256 }
  0x42   : > { %p286_p7 = scmp.ne.s32.totalorder %s441_s18, %s285_s24  ;;  %p290_p13 = scmp.lt.u32.totalorder %s441_s18, %s482_s1 }
  0x43   : > { %p291_p1 = scmp.lt.u32.totalorder %s289_s27, %s285_s24  ;;  %p293_p5 = scmp.lt.u32.totalorder %s285_s24, %s441_s18 }
  0x44   : > { %p287_p8 = pnand %p286_p7, %p493_p6 }
  0x45   : > { %p292_p0 = por %p291_p1, %p290_p13 }
  0x46   : > { %p288_p11 = pneg %p287_p8 }
  0x47   : > { %p294_p9 = por %p293_p5, %p292_p0 }
  0x49   : > { %p295_p10 = pnand %p294_p9, %p288_p11 }
  0x4b   : > { %298 = shalt.err (!%p295_p10)
}
  0x4c   : > { %197 = dma.vmem_to_hbm [thread:$0]  (%p493_p6), %s436_s11, 128, %s441_s18, %s111_s20  }
  0x4d PF: > { %p209_p12 = scmp.ge.s32.totalorder %s337_s9, 2  ;;  %s136_s30 = sand.u32 1, %s325_s6  }
  0x4e   : > { %p494_p2 = scmp.ne.s32.totalorder %s487_s17, 0  ;;  %s137_s2 = scalar_lea.sflag [#allocation4], %s136_s30 }
  0x50   : > { %p204_p3 = pnand %p209_p12, %p494_p2 }
  0x52   : > { %320 = dma.done.wait (!%p204_p3), %s137_s2, 128  }
  0x53   : > { %322 = vsyncadd (!%p204_p3), %s137_s2, 4294967168  ;;  %p12_p4 = scmp.ge.s32.totalorder %s376_s12, 4   ;;  %s495_s6 = smov %s329_s7 }
  0x54   : > { %s496_s7 = smov %s333_s8  ;;  %s497_s8 = smov %s387_s15 }
  0x55   : > { %s498_s9 = smov %s376_s12  ;;  %14 = sbr.rel (!%p12_p4) target bundleno = 4 (0x4), region = 61 }
  0x5c   :  { %142 = vsyncpa [#allocation3], 1 }
  0x5d   :  { %144 = vsyncpa [#allocation3 + $0x1], 1 }
  0x5e   :  { %145 = vsyncpa [#allocation4], 1 }
  0x5f   :  { %147 = vsyncpa [#allocation4 + $0x1], 1 }

// kernel: tpu_custom_call.1
= control target key start
LH: loop header
LB: loop body
LE: loop exit
PB: predicated region body
PF: predicated region fallthrough
CT: control target
= control target key end

     0   :  { %10 = vsyncpa [#allocation3], 0  ;;  %s1153_s0 = inlined_call_operand.hbm [shape: f32[2,8,32], index: 0, kind: input, shape index: {}]   ;;  %s1154_s1 = inlined_call_operand.vmem [shape: f32[1,32], index: 1, kind: input, shape index: {}]   ;;  %s1155_s2 = inlined_call_operand.vmem [shape: f32[1,32], index: 2, kind: input, shape index: {}]   ;;  %s1156_s3 = inlined_call_operand.hbm [shape: f32[32,96], index: 3, kind: input, shape index: {}]   ;;  %s1157_s4 = inlined_call_operand.vmem [shape: f32[1,96], index: 4, kind: input, shape index: {}]   ;;  %s1158_s5 = inlined_call_operand.hbm [shape: f32[2,3,4,8,8], index: 5, kind: output, shape index: {}]  }
   0x1   :  { %12 = vsyncpa [#allocation3 + $0x1], 0 }
   0x2   :  { %13 = vsyncpa [#allocation6], 0 }
   0x3   :  { %14 = vsyncpa [#allocation4], 0 }
   0x4   :  { %16 = vsyncpa [#allocation4 + $0x1], 0  ;;  %s897_s18 = smov 0   ;;  %s899_s19 = smov 0  }
   0x5   :  { %s901_s20 = smov 0   ;;  %s903_s21 = smov 0  }
   0x6   :  { %s905_s22 = smov 0   ;;  %s907_s23 = smov 0  }
   0x7 LB: > { %s555_s24 = sadd.s32 4294967295, %s844_s23   ;;  %s556_s25 = sadd.s32 4294967294, %s844_s23   ;;  %s844_s23 = sphi %s907_s23, %s22_s23   ;;  %s840_s22 = sphi %s905_s22, %s1182_s22   ;;  %s836_s21 = sphi %s903_s21, %s1181_s21   ;;  %s832_s20 = sphi %s901_s20, %s1180_s20   ;;  %s828_s19 = sphi %s899_s19, %s1179_s19   ;;  %s824_s18 = sphi %s897_s18, %s1178_s18  }
   0x8   : > { %p56_p0 = scmp.ne.s32.totalorder %s828_s19, %s824_s18  ;;  %p931_p1 = scmp.eq.s32.totalorder %s555_s24, 0 }
   0x9   : > { %p935_p2 = scmp.eq.s32.totalorder %s555_s24, 1  ;;  %p172_p3 = scmp.eq.s32.totalorder %s556_s25, 1 }
   0xa   : > { %s1163_s26 = scalar_select %p931_p1, 1, 0 }
   0xb   : > { %s1164_s27 = scalar_select %p935_p2, 1, 0 }
   0xc   : > { %p941_p4 = por %p931_p1, %p56_p0  ;;  %p557_p5 = scmp.ge.s32.totalorder %s844_s23, 1 }
   0xd   : > { %p946_p6 = por %p172_p3, %p56_p0  ;;  %p179_p7 = scmp.lt.s32.totalorder %s844_s23, 3 }
   0xe   : > { %s1165_s28 = scalar_select %p941_p4, 1, 0 }
   0xf   : > { %s1166_s29 = scalar_select %p946_p6, 1, 0 }
  0x10   : > { %p951_p8 = pnand %p557_p5, %p179_p7  ;;  %s846_s6 = smov [#allocation5]  }
  0x11   : > { %s197_s7 = sshll.u32 %s846_s6, 4  ;;  %s34_s9 = sadd.s32 1, %s840_s22  ;;  %s198_s7 = int_to_ptr.vmem [resolvable:$true] %s197_s7 }
  0x12   : > { %s1167_s30 = scalar_select %p951_p8, 1, 0 }
  0x13   : > { %p615_p9 = pneg %p951_p8  ;;  %s700_s12 = scalar_lea.hbm %s1156_s3, 512 }
  0x14   : > { %p701_p12 = scmp.ne.s32.totalorder %s1156_s3, %s700_s12  ;;  %p707_p5 = scmp.lt.u32.totalorder %s700_s12, %s1156_s3 }
  0x15   : > { %p960_p11 = pnand %p615_p9, %p931_p1 }
  0x17   : > { %p702_p13 = pneg %p960_p11 }
  0x19   : > { %p703_p0 = pnand %p702_p13, %p701_p12 }
  0x1b   : > { %p704_p3 = pneg %p703_p0 }
  0x1d   : > { %p709_p7 = pnand %p707_p5, %p704_p3 }
  0x1f   : > { %712 = shalt.err (!%p709_p7)
}
  0x20   : > { %s713_s17 = scalar_lea.vmem %s198_s7, 512  ;;  %p721_p1 = scmp.lt.s32.totalorder %s198_s7, %s198_s7 }
  0x21   : > { %p714_p9 = scmp.ne.s32.totalorder %s198_s7, %s713_s17  ;;  %p722_p4 = scmp.lt.s32.totalorder %s713_s17, %s713_s17 }
  0x23   : > { %p716_p10 = pnand %p714_p9, %p702_p13  ;;  %p723_p8 = por %p722_p4, %p721_p1 }
  0x25   : > { %p717_p6 = pneg %p716_p10 }
  0x27   : > { %p724_p2 = pnand %p723_p8, %p717_p6 }
  0x29   : > { %727 = shalt.err (!%p724_p2)
}
  0x2a   : > { %s847_s24 = smov 128   ;;  %s848_s25 = smov 8  }
  0x2b   : > { %618 = dma.hbm_to_vmem [thread:$0]  (!%p960_p11), %s1156_s3, 512, %s198_s7, [#allocation6], %s847_s24, %s847_s24, %s848_s25  }
  0x2c   : > { %p36_p1 = scmp.ge.s32.totalorder %s34_s9, 2  ;;  %s43_s11 = sadd.s32 1, %s832_s20 }
  0x2d   : > { %p50_p2 = scmp.ne.s32.totalorder %s832_s20, %s828_s19  ;;  %p51_p4 = scmp.eq.s32.totalorder %s844_s23, 0 }
  0x2e   : > { %s1184_s9 = smov (%p36_p1, %s34_s9), 0  ;;  %p1170_p8 = scmp.ne.s32.totalorder %s1164_s27, 0 }
  0x2f   : > { %p987_p6 = por %p51_p4, %p50_p2  ;;  %s38_s8 = ssub.s32 %s840_s22, %s1184_s9 }
  0x30   : > { %p993_p10 = por %p1170_p8, %p50_p2  ;;  %p628_p12 = scmp.lt.s32.totalorder %s844_s23, 2 }
  0x31   : > { %p41_p11 = scmp.eq.s32.totalorder %s38_s8, 0  ;;  %s214_s7 = sand.u32 1, %s832_s20  }
  0x32   : > { %s560_s14 = sshll.u32 %s214_s7, 3  ;;  %s561_s16 = sshll.u32 %s840_s22, 7 }
  0x33   : > { %s1002_s15 = scalar_select %p41_p11, %s832_s20, %s43_s11  }
  0x34   : > { %s1008_s25 = scalar_lea.hbm %s1153_s0, %s561_s16  ;;  %s218_s27 = scalar_lea.vmem [#allocation2], %s560_s14 }
  0x35   : > { %s226_s6 = sshll.u32 %s218_s27, 4  ;;  %p1014_p13 = pnand %p628_p12, %p987_p6  ;;  %s1010_s6 = int_to_ptr.vmem [resolvable:$true] %s226_s6 }
  0x36   : > { %s215_s11 = scalar_lea.sflag [#allocation3], %s214_s7  ;;  %s728_s8 = scalar_lea.hbm %s1008_s25, 128 }
  0x37   : > { %p729_p0 = scmp.ne.s32.totalorder %s1008_s25, %s728_s8  ;;  %p730_p3 = pneg %p1014_p13 }
  0x38   : > { %s733_s17 = scalar_lea.hbm %s1153_s0, 256  ;;  %p734_p9 = scmp.lt.u32.totalorder %s1008_s25, %s1153_s0 }
  0x39   : > { %p731_p5 = pnand %p730_p3, %p729_p0  ;;  %p735_p1 = scmp.lt.u32.totalorder %s733_s17, %s728_s8 }
  0x3a   : > { %p737_p4 = scmp.lt.u32.totalorder %s728_s8, %s1008_s25 }
  0x3b   : > { %p732_p7 = pneg %p731_p5  ;;  %p736_p2 = por %p735_p1, %p734_p9 }
  0x3d   : > { %p738_p6 = por %p737_p4, %p736_p2 }
  0x3f   : > { %p739_p8 = pnand %p738_p6, %p732_p7 }
  0x41   : > { %742 = shalt.err (!%p739_p8)
}
  0x42   : > { %s743_s7 = scalar_lea.vmem %s1010_s6, 128  ;;  %s849_s27 = smov [#allocation2]  }
  0x43   : > { %p744_p12 = scmp.ne.s32.totalorder %s1010_s6, %s743_s7  ;;  %s748_s14 = sshll.u32 %s849_s27, 4  ;;  %s749_s14 = int_to_ptr.vmem [resolvable:$false] %s748_s14 }
  0x44   : > { %s750_s16 = scalar_lea.vmem %s749_s14, 256  ;;  %p751_p5 = scmp.lt.s32.totalorder %s1010_s6, %s749_s14 }
  0x45   : > { %p746_p11 = pnand %p744_p12, %p730_p3  ;;  %p752_p9 = scmp.lt.s32.totalorder %s750_s16, %s743_s7 }
  0x47   : > { %p747_p0 = pneg %p746_p11  ;;  %p753_p1 = por %p752_p9, %p751_p5 }
  0x49   : > { %p754_p2 = pnand %p753_p1, %p747_p0 }
  0x4b   : > { %757 = shalt.err (!%p754_p2)
}
  0x4c   : > { %622 = dma.hbm_to_vmem [thread:$0]  (!%p1014_p13), %s1008_s25, 128, %s1010_s6, %s215_s11  }
  0x4d   : > { %p1173_p7 = scmp.ne.s32.totalorder %s1167_s30, 0 }
  0x4e   : > { %s1046_s8 = sand.u32 (!%p1173_p7), 1, %s828_s19   ;;  %p1174_p3 = scmp.ne.s32.totalorder (!%p1173_p7), %s1165_s28, 0 }
  0x4f   : > { %235 = sbr.rel (%p1173_p7) target bundleno = 780 (0x30c), region = 40  ;;  %s563_s17 = sshll.u32 (!%p1173_p7), %s1046_s8, 3 }
  0x50   : > { %s238_s12 = scalar_lea.sflag (!%p1173_p7), [#allocation3], %s1046_s8  ;;  %s241_s24 = scalar_lea.vmem (!%p1173_p7), [#allocation2], %s563_s17 }
  0x56   : > { %811 = dma.done.wait (%p1174_p3), %s238_s12, 128  }
  0x57   : > { %813 = vsyncadd (%p1174_p3), %s238_s12, 4294967168  ;;  %p1175_p4 = scmp.ne.s32.totalorder %s1163_s26, 0 }
  0x59   : > { %815 = dma.done.wait (%p1175_p4), [#allocation6], 512  }
  0x5a   : > { %817 = vsyncadd (%p1175_p4), [#allocation6], 4294966784  ;;  %vm273_vm0 = vcmask 261120   ;;  %v272_v0 = vld [vmem:[%s241_s24] sm:$0xff]  ;;  %v304_v7 = vld [vmem:[#allocation5] sm:$0xff]  ;;  %v850_v10 = vmov 0.0|0.0  }
  0x5b   : > { %v274_v1 = vsel %vm273_vm0, %v272_v0, 0.0  ;;  %v305_v8 = vld [vmem:[#allocation5 + $0x8] sm:$0xff]  ;;  %v306_v9 = vld [vmem:[#allocation5 + $0x10] sm:$0xff]  ;;  %599 = vmatprep.subr.bf16.mxu0 %v850_v10  ;;  %v307_v12 = vld [vmem:[#allocation5 + $0x18] sm:$0xff]  ;;  %vm851_vm1 = vmmov 0   ;;  %v852_v13 = vmov 0.0  }
  0x5c   : > { %275 = vadd.xlane.f32.xlu0 %v274_v1  ;;  %v600_v11 = vpack.c.bf16 %v305_v8, %v304_v7  ;;  %596 = vmatprep.mubr.msk.f32.mxu0 %vm851_vm1, %v852_v13  ;;  %v603_v14 = vpack.c.bf16 %v307_v12, %v306_v9  ;;  %v565_v19 = vld [vmem:[%s1154_s1] ss:$0 sm:$0xff]  ;;  %s605_s6 = smul.u32 96, %s1046_s8  ;;  %vm388_vm2 = vcmask 64512   ;;  %s853_s7 = smov 104  }
  0x5d   : > { %v566_v21 = vld [vmem:[%s1155_s2] ss:$0 sm:$0xff]  ;;  %s854_s27 = smov 120   ;;  %s855_s16 = smov 48  }
  0x5e   : > { %601 = vmatpush3.bf16.msra.mxu0 %v600_v11  ;;  %v567_v24 = vld [vmem:[%s1157_s4] ss:$0 sm:$0xff]  ;;  %s1071_s14 = scalar_lea.vmem [#allocation7], %s605_s6  ;;  %s856_s17 = smov 112  }
  0x5f   : > { %602 = vmatprep.subr.bf16.mxu0 %v850_v10  ;;  %s857_s12 = smov 96   ;;  %s858_s24 = smov 88  }
  0x60   : > { %s859_s26 = smov 80   ;;  %s860_s28 = smov 72  }
  0x61   : > { %s861_s30 = smov 64   ;;  %s862_s25 = smov 56  }
  0x62   : > { %604 = vmatpush3.bf16.msra.mxu0 %v603_v14  ;;  %s863_s6 = smov 40   ;;  %s606_s10 = smul.u32 1536, %s836_s21 }
  0x63   : > { %s461_s11 = sshll.u32 %s1071_s14, 4  ;;  %s864_s21 = smov [#allocation7]   ;;  %s1102_s11 = int_to_ptr.vmem [resolvable:$true] %s461_s11 }
  0xe9   : > { %v276_v2 = vpop.xlane.xlu0 %275 }
  0xea   : > { %v278_v3 = vmul.f32 0.03125, %v276_v2 }
  0xec   : > { %v279_v4 = vsub.f32 %v272_v0, %v278_v3 }
  0xee   : > { %v280_v5 = vmul.f32 %v279_v4, %v279_v4 }
  0xf0   : > { %v281_v6 = vsel %vm273_vm0, %v280_v5, 0.0 }
  0xf1   : > { %282 = vadd.xlane.f32.xlu0 %v281_v6 }
 0x17e   : > { %v283_v15 = vpop.xlane.xlu0 %282 }
 0x17f   : > { %v284_v16 = vmul.f32 0.03125, %v283_v15 }
 0x181   : > { %v285_v17 = vadd.f32 1e-05, %v284_v16 }
 0x183   : > { %698 = vrsqrt.f32 %v285_v17 }
 0x18d   : > { %v699_v18 = vpop.eup %698 }
 0x18e   : > { %v287_v20 = vmul.f32 %v699_v18, %v279_v4 }
 0x190   : > { %v295_v22 = vmul.f32 %v565_v19, %v287_v20 }
 0x192   : > { %v303_v23 = vadd.f32 %v566_v21, %v295_v22 }
 0x194   : > { %597 = vmatmul.mubr.msk.f32.vlgmr.msra.gmra.mrb[0].mxu0 %vm273_vm0, %v303_v23 }
 0x267   : > { %v384_v25 = vpop.f32.mrb[0].mxu0 }
 0x268   : > { %v385_v26 = vadd.f32 %v567_v24, %v384_v25  ;;  %v598_v27 = vpop.f32.mrb[1].mxu0 }
 0x26a   : > { %401 = vrot.lane.b32.xlu0 %v385_v26, %s853_s7  ;;  %391 = vrot.lane.b32.xlu1 %v385_v26, %s854_s27  ;;  %389 = vst.msk [vmem:[%s1071_s14] sm:$0xff] %vm388_vm2, %v385_v26 }
 0x26e   : > { %436 = vrot.lane.b32.xlu0 %v385_v26, %s855_s16  ;;  %396 = vrot.lane.b32.xlu1 %v385_v26, %s856_s17  ;;  %s1100_s16 = scalar_lea.hbm %s1158_s5, %s606_s10  ;;  %s447_s17 = scalar_lea.sflag [#allocation4], %s1046_s8 }
 0x272   : > { %406 = vrot.lane.b32.xlu1 %v385_v26, %s857_s12  ;;  %s758_s12 = scalar_lea.vmem %s1102_s11, 1536 }
 0x273   : > { %p759_p13 = scmp.ne.s32.totalorder %s1102_s11, %s758_s12 }
 0x275   : > { %p760_p6 = pnand %p759_p13, %p993_p10 }
 0x276   : > { %411 = vrot.lane.b32.xlu1 %v385_v26, %s858_s24  ;;  %s762_s24 = sshll.u32 %s864_s21, 4  ;;  %s763_s24 = int_to_ptr.vmem [resolvable:$false] %s762_s24 }
 0x277   : > { %p761_p8 = pneg %p760_p6  ;;  %p765_p12 = scmp.lt.s32.totalorder %s1102_s11, %s763_s24 }
 0x27a   : > { %416 = vrot.lane.b32.xlu1 %v385_v26, %s859_s26  ;;  %s764_s26 = scalar_lea.vmem %s763_s24, 3072 }
 0x27b   : > { %p766_p11 = scmp.lt.s32.totalorder %s764_s26, %s758_s12 }
 0x27d   : > { %p767_p0 = por %p766_p11, %p765_p12 }
 0x27e   : > { %421 = vrot.lane.b32.xlu1 %v385_v26, %s860_s28 }
 0x27f   : > { %p768_p5 = pnand %p767_p0, %p761_p8 }
 0x282   : > { %426 = vrot.lane.b32.xlu1 %v385_v26, %s861_s30 }
 0x286   : > { %431 = vrot.lane.b32.xlu1 %v385_v26, %s862_s25 }
 0x28a   : > { %441 = vrot.lane.b32.xlu1 %v385_v26, %s863_s6 }
 0x2dc   : > { %v402_v28 = vpop.permute.xlu0 %401  ;;  %v392_v29 = vpop.permute.xlu1 %391 }
 0x2dd   : > { %571 = vst.msk [vmem:[%s1071_s14 + $0x18] sm:$0xff] %vm388_vm2, %v402_v28  ;;  %569 = vst.msk [vmem:[%s1071_s14 + $0x8] sm:$0xff] %vm388_vm2, %v392_v29 }
 0x2e0   : > { %v437_v30 = vpop.permute.xlu0 %436  ;;  %v397_v31 = vpop.permute.xlu1 %396 }
 0x2e1   : > { %578 = vst.msk [vmem:[%s1071_s14 + $0x50] sm:$0xff] %vm388_vm2, %v437_v30  ;;  %570 = vst.msk [vmem:[%s1071_s14 + $0x10] sm:$0xff] %vm388_vm2, %v397_v31 }
 0x2e4   : > { %v407_v32 = vpop.permute.xlu1 %406 }
 0x2e5   : > { %572 = vst.msk [vmem:[%s1071_s14 + $0x20] sm:$0xff] %vm388_vm2, %v407_v32 }
 0x2e8   : > { %v412_v33 = vpop.permute.xlu1 %411 }
 0x2e9   : > { %573 = vst.msk [vmem:[%s1071_s14 + $0x28] sm:$0xff] %vm388_vm2, %v412_v33 }
 0x2ec   : > { %v417_v34 = vpop.permute.xlu1 %416 }
 0x2ed   : > { %574 = vst.msk [vmem:[%s1071_s14 + $0x30] sm:$0xff] %vm388_vm2, %v417_v34 }
 0x2f0   : > { %v422_v35 = vpop.permute.xlu1 %421 }
 0x2f1   : > { %575 = vst.msk [vmem:[%s1071_s14 + $0x38] sm:$0xff] %vm388_vm2, %v422_v35 }
 0x2f4   : > { %v427_v36 = vpop.permute.xlu1 %426 }
 0x2f5   : > { %576 = vst.msk [vmem:[%s1071_s14 + $0x40] sm:$0xff] %vm388_vm2, %v427_v36 }
 0x2f8   : > { %v432_v37 = vpop.permute.xlu1 %431 }
 0x2f9   : > { %577 = vst.msk [vmem:[%s1071_s14 + $0x48] sm:$0xff] %vm388_vm2, %v432_v37 }
 0x2fc   : > { %v442_v38 = vpop.permute.xlu1 %441 }
 0x2fd   : > { %579 = vst.msk [vmem:[%s1071_s14 + $0x58] sm:$0xff] %vm388_vm2, %v442_v38 }
 0x2fe   : > { %771 = shalt.err (!%p768_p5)
}
 0x2ff   : > { %s772_s14 = scalar_lea.hbm %s1100_s16, 1536  ;;  %s776_s25 = scalar_lea.hbm %s1158_s5, 3072 }
 0x300   : > { %p773_p9 = scmp.ne.s32.totalorder %s1100_s16, %s772_s14  ;;  %p777_p7 = scmp.lt.u32.totalorder %s1100_s16, %s1158_s5 }
 0x301   : > { %p778_p3 = scmp.lt.u32.totalorder %s776_s25, %s772_s14  ;;  %p780_p13 = scmp.lt.u32.totalorder %s772_s14, %s1100_s16 }
 0x302   : > { %p774_p1 = pnand %p773_p9, %p993_p10 }
 0x303   : > { %p779_p4 = por %p778_p3, %p777_p7 }
 0x304   : > { %p775_p2 = pneg %p774_p1 }
 0x305   : > { %p781_p6 = por %p780_p13, %p779_p4 }
 0x307   : > { %p782_p8 = pnand %p781_p6, %p775_p2 }
 0x309   : > { %785 = shalt.err (!%p782_p8)
}
 0x30a   : > { %s865_s7 = smov 128   ;;  %s866_s27 = smov 8  }
 0x30b   : > { %613 = dma.vmem_to_hbm [thread:$0]  (%p993_p10), %s1102_s11, 1536, %s1100_s16, %s447_s17, %s865_s7, %s865_s7, %s866_s27  }
 0x30c PF: > { %s476_s12 = sand.u32 1, %s824_s18   ;;  %p1176_p12 = scmp.ne.s32.totalorder %s1166_s29, 0 }
 0x30d   : > { %p1177_p11 = scmp.ge.s32.totalorder %s844_s23, 2  ;;  %s477_s21 = scalar_lea.sflag [#allocation4], %s476_s12 }
 0x30f   : > { %p624_p0 = pnand %p1177_p11, %p1176_p12 }
 0x311   : > { %819 = dma.done.wait (!%p624_p0), %s477_s21, 1536  }
 0x312   : > { %821 = vsyncadd (!%p624_p0), %s477_s21, 4294965760  ;;  %s22_s23 = sadd.s32 1, %s844_s23   ;;  %s1178_s18 = smov %s828_s19 }
 0x313   : > { %p19_p5 = scmp.ge.s32.totalorder %s22_s23, 4   ;;  %s1179_s19 = smov %s832_s20 }
 0x314   : > { %s1180_s20 = smov %s1002_s15  ;;  %s1181_s21 = smov %s840_s22 }
 0x315   : > { %s1182_s22 = smov %s1184_s9  ;;  %21 = sbr.rel (!%p19_p5) target bundleno = 7 (0x7), region = 100 }
 0x31c   :  { %482 = vsyncpa [#allocation3], 1 }
 0x31d   :  { %484 = vsyncpa [#allocation3 + $0x1], 1 }
 0x31e   :  { %485 = vsyncpa [#allocation6], 1 }
 0x31f   :  { %486 = vsyncpa [#allocation4], 1 }
 0x320   :  { %488 = vsyncpa [#allocation4 + $0x1], 1 }

</bundles_post_ra>
